<compile_context>
chip_gen: v7x
topology: tpu7x:2x2x1
jax: 0.10.0
libtpu: 0.0.40
codegen_flags: <defaults>
</compile_context>

<pallas_src>
import functools

import numpy as np
import jax
import jax.numpy as jnp
from jax import lax
from jax.experimental import pallas as pl
from jax.experimental.pallas import tpu as pltpu


LANE = 128


def _round_up(n, m):
    return ((n + m - 1) // m) * m


def _default_vmem_limit():
    """Scoped-VMEM budget: most of physical VMEM when queryable (v5e/v6e: 128 MiB,
    v7x: 64 MiB), conservative 32 MiB fallback otherwise."""
    try:
        cap = int(pltpu.get_tpu_info().vmem_capacity_bytes)
        return int(min((cap * 3) // 4, 96 * 1024 * 1024))
    except Exception:
        return 32 * 1024 * 1024


_VMEM_LIMIT = _default_vmem_limit()


def _pick_tile(n, target, align):
    """Largest tile <= target dividing n, preferring `align`-aligned tiles."""
    if n <= target:
        return n
    best = None
    for t in range(target, 0, -1):
        if n % t == 0:
            if t % align == 0:
                return t
            if best is None:
                best = t
    return best if best is not None else n


# ------------------------- generic tiled matmul (backbone 1x1) -------------------------

def _matmul_kernel(x_ref, w_ref, o_ref, acc_ref, *, relu):
    k = pl.program_id(2)

    @pl.when(k == 0)
    def _init():
        acc_ref[...] = jnp.zeros_like(acc_ref)

    acc_ref[...] += jnp.dot(x_ref[...], w_ref[...],
                            preferred_element_type=jnp.float32)

    @pl.when(k == pl.num_programs(2) - 1)
    def _finalize():
        y = acc_ref[...]
        if relu:
            y = jnp.maximum(y, 0.0)
        o_ref[...] = y.astype(o_ref.dtype)


def matmul(x, w, *, relu, out_dtype, tm=1024, tn=256, tk=1024):
    """(M, K) @ (K, N) with f32 accumulation and optional fused ReLU."""
    M, K = x.shape
    K2, N = w.shape
    assert K == K2
    # Pad M up to a multiple of 8 so block shapes never fall back to unaligned tiles.
    Mp = _round_up(M, 8)
    if Mp != M:
        x = jnp.pad(x, ((0, Mp - M), (0, 0)))
    tm = _pick_tile(Mp, tm, 8)
    tn = _pick_tile(N, tn, LANE)
    tk = _pick_tile(K, tk, LANE)
    grid = (Mp // tm, N // tn, K // tk)
    out = pl.pallas_call(
        functools.partial(_matmul_kernel, relu=relu),
        out_shape=jax.ShapeDtypeStruct((Mp, N), out_dtype),
        grid=grid,
        in_specs=[
            pl.BlockSpec((tm, tk), lambda i, j, k: (i, k)),
            pl.BlockSpec((tk, tn), lambda i, j, k: (k, j)),
        ],
        out_specs=pl.BlockSpec((tm, tn), lambda i, j, k: (i, j)),
        scratch_shapes=[pltpu.VMEM((tm, tn), jnp.float32)],
        compiler_params=pltpu.CompilerParams(
            dimension_semantics=("parallel", "parallel", "arbitrary"),
            vmem_limit_bytes=_VMEM_LIMIT),
    )(x, w)
    return out[:M] if Mp != M else out


# --------------------- 3x3 conv + folded BatchNorm + ReLU kernel ---------------------

def _conv3x3_bn_relu_kernel(x_ref, w_ref, scale_ref, bias_ref, o_ref, acc_ref):
    # x_ref:     (Bt, Hp, Wp, kt)  bf16 activations (Bt images, one Cin tile)
    # w_ref:     (9, kt, nt)       bf16 weights, tap index = dy*3 + dx
    # scale/bias:(1, nt)           f32 folded eval-mode BN affine
    # o_ref:     (Bt, Hp, Wp, nt)
    # acc_ref:   (Bt*Hp*Wp, nt)    f32 VMEM accumulator (lives across the K grid axis)
    k = pl.program_id(2)

    @pl.when(k == 0)
    def _init():
        acc_ref[...] = jnp.zeros_like(acc_ref)

    x = x_ref[...]                          # (Bt, Hp, Wp, kt) bf16
    bt, hp, wp, kt = x.shape

    # W-direction shifted copies with zero borders.  The shift is along the sublane
    # axis -> XLU rotate (on an f32 copy: plain 32-bit sublane rotate) + cheap mask,
    # no misaligned sublane slices.
    w_idx = lax.broadcasted_iota(jnp.int32, (1, 1, wp, 1), 2)
    x32 = x.astype(jnp.float32)
    x_wm = jnp.where(w_idx == 0, 0.0,
                     pltpu.roll(x32, 1, axis=2)).astype(x.dtype)        # x[:, :, w-1, :]
    x_wp = jnp.where(w_idx == wp - 1, 0.0,
                     pltpu.roll(x32, wp - 1, axis=2)).astype(x.dtype)   # x[:, :, w+1, :]
    cols = (x_wm, x, x_wp)                  # indexed by dx = 0, 1, 2

    # H-direction shifts are along a major (untiled) dim: cheap per-image slice +
    # concat with a zero row.  Keeping the Bt axis prevents cross-image bleed.
    zrow = jnp.zeros((bt, 1, wp, kt), x.dtype)
    taps = []
    for dy in range(3):
        for dx in range(3):
            xc = cols[dx]
            if dy == 0:
                xs = jnp.concatenate([zrow, xc[:, :hp - 1]], axis=1)    # x[h-1]
            elif dy == 1:
                xs = xc                                                 # x[h]
            else:
                xs = jnp.concatenate([xc[:, 1:], zrow], axis=1)         # x[h+1]
            taps.append(xs)

    # Single MXU contraction per K step: (Bt*Hp*Wp, 9*kt) @ (9*kt, nt) -> one
    # accumulator update instead of 9 full read-modify-writes.
    x_cat = jnp.concatenate(taps, axis=-1).reshape(bt * hp * wp, 9 * kt)
    w_mat = w_ref[...].reshape(9 * kt, w_ref.shape[-1])
    acc_ref[...] += jnp.dot(x_cat, w_mat, preferred_element_type=jnp.float32)

    @pl.when(k == pl.num_programs(2) - 1)
    def _finalize():
        y = acc_ref[...] * scale_ref[...] + bias_ref[...]   # BN (eval) epilogue in f32
        o_ref[...] = jnp.maximum(y, 0.0).reshape(o_ref.shape).astype(o_ref.dtype)


def conv3x3_bn_relu(x, w9, scale, bias, *, nt_target=256, kt_target=512):
    """3x3 conv (padding=1, stride=1, bias-free) + folded BatchNorm + ReLU (NHWC)."""
    B, Hp, Wp, K = x.shape
    Cout = w9.shape[2]
    nt = _pick_tile(Cout, nt_target, LANE)
    kt = _pick_tile(K, kt_target, LANE)
    # Batch-tile so the matmul M dim reaches >=256 rows (full MXU height on v6e/v7x).
    bt = _pick_tile(B, max(1, -(-256 // (Hp * Wp))), 1)
    grid = (B // bt, Cout // nt, K // kt)
    # TODO(synk): at real FCN sizes (Hp=Wp=56, mid=512) add spatial (H) tiling with a
    # 1-row halo and loop the Cout tiles inside the kernel so the shifted-activation
    # build is amortized and the block fits v7x's 64 MiB VMEM.
    return pl.pallas_call(
        _conv3x3_bn_relu_kernel,
        out_shape=jax.ShapeDtypeStruct((B, Hp, Wp, Cout), x.dtype),
        grid=grid,
        in_specs=[
            pl.BlockSpec((bt, Hp, Wp, kt), lambda b, j, k: (b, 0, 0, k)),
            pl.BlockSpec((9, kt, nt), lambda b, j, k: (0, k, j)),
            pl.BlockSpec((1, nt), lambda b, j, k: (0, j)),
            pl.BlockSpec((1, nt), lambda b, j, k: (0, j)),
        ],
        out_specs=pl.BlockSpec((bt, Hp, Wp, nt), lambda b, j, k: (b, 0, 0, j)),
        scratch_shapes=[pltpu.VMEM((bt * Hp * Wp, nt), jnp.float32)],
        compiler_params=pltpu.CompilerParams(
            dimension_semantics=("parallel", "parallel", "arbitrary"),
            vmem_limit_bytes=_VMEM_LIMIT),
    )(x, w9, scale, bias)


# ------------- fused 1x1 conv + bilinear upsample (align_corners=True) kernel -------------

def _conv1x1_upsample_kernel(y_ref, w2_ref, m_ref, o_ref):
    # y_ref:  (1, HWin, mid_p) bf16 NHWC-flat features for one image
    # w2_ref: (mid_p, nc_p)    bf16 1x1-conv weight
    # m_ref:  (HWin, HWout)    f32 Kronecker bilinear weights (ry ⊗ rx)
    # o_ref:  (1, nc_p, HWout) f32 class-major, lane-dense (HWout = H*W) store
    logits = jnp.dot(y_ref[0], w2_ref[...],
                     preferred_element_type=jnp.float32)               # (HWin, nc_p)
    out = lax.dot_general(logits, m_ref[...], (((0,), (0,)), ((), ())),
                          preferred_element_type=jnp.float32)           # (nc_p, HWout)
    o_ref[...] = out[None]


def conv1x1_upsample(y, w2, m_interp):
    """1x1 conv (bias-free) fused with bilinear upsample; logits never hit HBM.

    y: (B, Hin*Win, mid_p) bf16 -> returns (B, nc_p, Hout*Wout) f32.
    """
    B, HWin, mid_p = y.shape
    nc_p = w2.shape[1]
    HWout = m_interp.shape[1]
    return pl.pallas_call(
        _conv1x1_upsample_kernel,
        out_shape=jax.ShapeDtypeStruct((B, nc_p, HWout), jnp.float32),
        grid=(B,),
        in_specs=[
            pl.BlockSpec((1, HWin, mid_p), lambda b: (b, 0, 0)),
            pl.BlockSpec((mid_p, nc_p), lambda b: (0, 0)),
            pl.BlockSpec((HWin, HWout), lambda b: (0, 0)),
        ],
        out_specs=pl.BlockSpec((1, nc_p, HWout), lambda b: (b, 0, 0)),
        compiler_params=pltpu.CompilerParams(
            dimension_semantics=("parallel",),
            vmem_limit_bytes=_VMEM_LIMIT),
    )(y, w2, m_interp)


# ------------------------------------ parameters ------------------------------------

def _interp_matrix_np(n_out, n_in):
    """Host-precomputed row-interpolation matrix, bilinear align_corners=True."""
    if n_out == 1:
        src = np.zeros((1,), np.float32)
    else:
        src = np.arange(n_out, dtype=np.float32) * (n_in - 1) / (n_out - 1)
    i0 = np.clip(np.floor(src).astype(np.int64), 0, n_in - 1)
    i1 = np.clip(i0 + 1, 0, n_in - 1)
    f = (src - i0).astype(np.float32)
    m = np.zeros((n_out, n_in), np.float32)
    rows = np.arange(n_out)
    m[rows, i0] += 1.0 - f
    m[rows, i1] += f
    return m


def kaiming_uniform(key, cout, cin, kh, kw):
    # torch.nn.init.kaiming_uniform_ default: a=0, fan_in, leaky_relu gain=sqrt(2)
    fan_in = cin * kh * kw
    bound = (6.0 / fan_in) ** 0.5
    return jax.random.uniform(key, (cout, cin, kh, kw), jnp.float32, -bound, bound)


def init_params(key, in_channels, backbone_out_channels, num_classes, in_size):
    H, W = in_size
    Hp, Wp = H // 4, W // 4
    cb = backbone_out_channels
    mid = cb // 4
    cb_p = _round_up(cb, LANE)
    mid_p = _round_up(mid, LANE)
    nc_p = _round_up(num_classes, LANE)
    bf16 = jnp.bfloat16

    k1, k2, k3 = jax.random.split(key, 3)
    wb = kaiming_uniform(k1, cb, in_channels, 1, 1)      # backbone 1x1 (OIHW)
    w1 = kaiming_uniform(k2, mid, cb, 3, 3)              # conv1 3x3 (OIHW)
    w2 = kaiming_uniform(k3, num_classes, mid, 1, 1)     # conv2 1x1 (OIHW)

    # Backbone 1x1 with the 4x4 average pool folded in: each of the 16 pooled taps
    # gets weight/16 -> (Cin*16, cb_p); raises the matmul K from Cin to Cin*16.
    wb_t = jnp.transpose(wb[:, :, 0, 0])                 # (Cin, cb)
    wb_fold = jnp.repeat(wb_t, 16, axis=0) / 16.0        # (Cin*16, cb); row = ci*16 + tap
    wb_k = jnp.zeros((in_channels * 16, cb_p), bf16).at[:, :cb].set(wb_fold.astype(bf16))

    # conv1 3x3: OIHW -> (9, cb_p, mid_p), zero-padded, bf16 (tap = dy*3 + dx).
    w1_hwio = jnp.transpose(w1, (2, 3, 1, 0)).reshape(9, cb, mid)
    w1_k = jnp.zeros((9, cb_p, mid_p), bf16).at[:, :cb, :mid].set(w1_hwio.astype(bf16))

    # conv2 1x1: (mid_p, nc_p), zero-padded, bf16.
    w2_k = jnp.zeros((mid_p, nc_p), bf16).at[:mid, :num_classes].set(
        jnp.transpose(w2[:, :, 0, 0]).astype(bf16))

    # Eval-mode BatchNorm fold: gamma=1, beta=0, running_mean=0, running_var=1, eps=1e-5.
    eps = 1e-5
    bn_scale = jnp.full((1, mid_p), 1.0 / np.sqrt(1.0 + eps), jnp.float32)
    bn_bias = jnp.zeros((1, mid_p), jnp.float32)

    # Bilinear align_corners=True weights precomputed on the host as the Kronecker
    # matrix M[(hi,wi),(ho,wo)] = ry[ho,hi]*rx[wo,wi], so the upsample is a single
    # lane-dense matmul per image.  Kept in f32 for accuracy.
    # TODO(synk): at large in_size switch to the separable ry/rx two-matmul form with
    # spatial tiling (the Kronecker matrix grows as (Hp*Wp) x (H*W)).
    ry = _interp_matrix_np(H, Hp)                        # (H, Hp)
    rx = _interp_matrix_np(W, Wp)                        # (W, Wp)
    m_kron = np.einsum("oh,pw->hwop", ry, rx).reshape(Hp * Wp, H * W)

    return {
        "backbone_w": wb_k,
        "conv1_w9": w1_k,
        "bn1_scale": bn_scale,
        "bn1_bias": bn_bias,
        "conv2_w": w2_k,
        "m_interp": jnp.asarray(m_kron, jnp.float32),
        "num_classes": num_classes,
    }


# ------------------------------------- forward --------------------------------------

def fcn_forward(x_nchw, params):
    B, Cin, H, W = x_nchw.shape
    Hp, Wp = H // 4, W // 4
    nc = params["num_classes"]
    bf16 = jnp.bfloat16

    # --- synthetic backbone: 4x4 avg-pool + 1x1 conv + ReLU, pool folded into the
    # matmul (x presented as 4x4 patches, weight /16 replicated over the 16 taps) ---
    patches = x_nchw.reshape(B, Cin, Hp, 4, Wp, 4).transpose(0, 2, 4, 1, 3, 5)
    patches = patches.reshape(B * Hp * Wp, Cin * 16).astype(bf16)
    cb_p = params["backbone_w"].shape[1]
    feat = matmul(patches, params["backbone_w"], relu=True, out_dtype=bf16)
    feat = feat.reshape(B, Hp, Wp, cb_p)                                # (B,Hp,Wp,cb_p)

    # --- FCN head: conv3x3(bias=False) + BN(eval) + ReLU ---
    y = conv3x3_bn_relu(feat, params["conv1_w9"],
                        params["bn1_scale"], params["bn1_bias"])        # (B,Hp,Wp,mid_p)
    # Dropout2d(p=0.1) is identity at inference time.

    # --- conv1x1(bias=False) fused with the bilinear upsample: logits never hit HBM,
    # output is class-major with a lane-dense H*W last dim ---
    mid_p, nc_p = params["conv2_w"].shape
    out = conv1x1_upsample(y.reshape(B, Hp * Wp, mid_p),
                           params["conv2_w"], params["m_interp"])       # (B,nc_p,H*W)
    return out.reshape(B, nc_p, H, W)[:, :nc]


# ------------------------------------ reference -------------------------------------

def ref_forward(x_nchw, params):
    """Pure-JAX reference that mirrors the kernel path's bf16 rounding points."""
    B, Cin, H, W = x_nchw.shape
    Hp, Wp = H // 4, W // 4
    nc = params["num_classes"]
    f32 = jnp.float32

    patches = x_nchw.reshape(B, Cin, Hp, 4, Wp, 4).transpose(0, 2, 4, 1, 3, 5)
    patches = patches.reshape(B, Hp, Wp, Cin * 16).astype(jnp.bfloat16).astype(f32)
    wb = params["backbone_w"].astype(f32)
    feat = jnp.maximum(jnp.einsum("bhwc,cd->bhwd", patches, wb), 0.0)
    feat = feat.astype(jnp.bfloat16).astype(f32)

    cb_p, mid_p = params["conv1_w9"].shape[1], params["conv1_w9"].shape[2]
    w1 = params["conv1_w9"].astype(f32).reshape(3, 3, cb_p, mid_p)
    y = jax.lax.conv_general_dilated(
        feat, w1, (1, 1), ((1, 1), (1, 1)),
        dimension_numbers=("NHWC", "HWIO", "NHWC"))
    y = jnp.maximum(y * params["bn1_scale"][0] + params["bn1_bias"][0], 0.0)
    y = y.astype(jnp.bfloat16).astype(f32)

    w2 = params["conv2_w"].astype(f32)
    logits = jnp.einsum("bhwc,cd->bhwd", y, w2)[..., :nc]     # (B, Hp, Wp, nc)

    # bilinear upsample, align_corners=True (independent gather-based formulation)
    sy = jnp.arange(H) * (Hp - 1) / (H - 1)
    sx = jnp.arange(W) * (Wp - 1) / (W - 1)
    y0 = jnp.clip(jnp.floor(sy).astype(jnp.int32), 0, Hp - 1)
    y1i = jnp.clip(y0 + 1, 0, Hp - 1)
    x0 = jnp.clip(jnp.floor(sx).astype(jnp.int32), 0, Wp - 1)
    x1i = jnp.clip(x0 + 1, 0, Wp - 1)
    fy = (sy - y0)[None, :, None, None]
    fx = (sx - x0)[None, None, :, None]
    g = lambda yi, xi: logits[:, yi][:, :, xi]
    out = ((1 - fy) * (1 - fx) * g(y0, x0) + (1 - fy) * fx * g(y0, x1i)
           + fy * (1 - fx) * g(y1i, x0) + fy * fx * g(y1i, x1i))
    return jnp.transpose(out, (0, 3, 1, 2))


# --------------------------------------- main ---------------------------------------

if __name__ == "__main__":
    key = jax.random.PRNGKey(0)
    kx, kp = jax.random.split(key)

    B, Cin, H, W = 2, 3, 32, 32
    backbone_out_channels = 64           # scaled down from 2048 (mid = 16)
    num_classes = 21

    x = jax.random.normal(kx, (B, Cin, H, W), jnp.float32)
    params = init_params(kp, Cin, backbone_out_channels, num_classes, (H, W))

    out = jax.block_until_ready(fcn_forward(x, params))
    assert out.shape == (B, num_classes, H, W), out.shape

    ref = jax.block_until_ready(ref_forward(x, params))
    err = float(jnp.max(jnp.abs(out - ref)))
    assert err < 5e-3, f"mismatch vs reference: {err}"

    print("KERNEL_OK")
</pallas_src>

<mosaic_0001>
module attributes {stable_mosaic.version = 11 : i64} {
  func.func @_matmul_kernel(%arg0: i32, %arg1: i32, %arg2: i32, %arg3: memref<128x48xbf16, #tpu.memory_space<vmem>>, %arg4: memref<48x128xbf16, #tpu.memory_space<vmem>>, %arg5: memref<128x128xbf16, #tpu.memory_space<vmem>>, %arg6: memref<128x128xf32, #tpu.memory_space<vmem>>) attributes {dimension_semantics = [#tpu.dimension_semantics<parallel>, #tpu.dimension_semantics<parallel>, #tpu.dimension_semantics<arbitrary>], iteration_bounds = array<i64: 1, 1, 1>, scalar_prefetch = 0 : i64, scratch_operands = 1 : i64, tpu.core_type = #tpu.core_type<tc>, window_params = [{transform_indices = @transform_0, window_bounds = array<i64: 128, 48>}, {transform_indices = @transform_1, window_bounds = array<i64: 48, 128>}, {transform_indices = @transform_2, window_bounds = array<i64: 128, 128>}]} {
    %c0_i32 = arith.constant 0 : i32
    %0 = arith.cmpi eq, %arg2, %c0_i32 : i32
    %1 = arith.extui %0 : i1 to i32
    %c0_i32_0 = arith.constant 0 : i32
    %2 = arith.cmpi ne, %1, %c0_i32_0 : i32
    scf.if %2 {
      %cst_10 = arith.constant 0.000000e+00 : f32
      %12 = vector.broadcast %cst_10 : f32 to vector<128x128xf32>
      %c0_11 = arith.constant 0 : index
      %c0_12 = arith.constant 0 : index
      %13 = vector.load %arg6[%c0_11, %c0_12] : memref<128x128xf32, #tpu.memory_space<vmem>>, vector<128x128xf32>
      tpu.vector_store %arg6[%c0_11, %c0_12], %12 {strides = array<i32>} : memref<128x128xf32, #tpu.memory_space<vmem>>, vector<128x128xf32>,
    } else {
    }
    %c0 = arith.constant 0 : index
    %c0_1 = arith.constant 0 : index
    %3 = vector.load %arg6[%c0, %c0_1] : memref<128x128xf32, #tpu.memory_space<vmem>>, vector<128x128xf32>
    %c0_2 = arith.constant 0 : index
    %c0_3 = arith.constant 0 : index
    %4 = vector.load %arg3[%c0_2, %c0_3] : memref<128x48xbf16, #tpu.memory_space<vmem>>, vector<128x48xbf16>
    %c0_4 = arith.constant 0 : index
    %c0_5 = arith.constant 0 : index
    %5 = vector.load %arg4[%c0_4, %c0_5] : memref<48x128xbf16, #tpu.memory_space<vmem>>, vector<48x128xbf16>
    %cst = arith.constant dense<0.000000e+00> : vector<128x128xf32>
    %6 = tpu.matmul %4, %5, %cst {dimension_numbers = #tpu.dot_dimension_numbers<[1], [0], [0], [1], [0, 0, 1, 1], [], []>} : vector<128x48xbf16>, vector<48x128xbf16>, vector<128x128xf32> -> vector<128x128xf32>
    %7 = arith.addf %3, %6 : vector<128x128xf32>
    %c0_6 = arith.constant 0 : index
    %c0_7 = arith.constant 0 : index
    %8 = vector.load %arg6[%c0_6, %c0_7] : memref<128x128xf32, #tpu.memory_space<vmem>>, vector<128x128xf32>
    tpu.vector_store %arg6[%c0_6, %c0_7], %7 {strides = array<i32>} : memref<128x128xf32, #tpu.memory_space<vmem>>, vector<128x128xf32>,
    %c0_i32_8 = arith.constant 0 : i32
    %9 = arith.cmpi eq, %arg2, %c0_i32_8 : i32
    %10 = arith.extui %9 : i1 to i32
    %c0_i32_9 = arith.constant 0 : i32
    %11 = arith.cmpi ne, %10, %c0_i32_9 : i32
    scf.if %11 {
      %c0_10 = arith.constant 0 : index
      %c0_11 = arith.constant 0 : index
      %12 = vector.load %arg6[%c0_10, %c0_11] : memref<128x128xf32, #tpu.memory_space<vmem>>, vector<128x128xf32>
      %cst_12 = arith.constant 0.000000e+00 : f32
      %13 = vector.broadcast %cst_12 : f32 to vector<128x128xf32>
      %14 = arith.maximumf %12, %13 : vector<128x128xf32>
      %15 = arith.truncf %14 : vector<128x128xf32> to vector<128x128xbf16>
      %c0_13 = arith.constant 0 : index
      %c0_14 = arith.constant 0 : index
      %16 = vector.load %arg5[%c0_13, %c0_14] : memref<128x128xbf16, #tpu.memory_space<vmem>>, vector<128x128xbf16>
      tpu.vector_store %arg5[%c0_13, %c0_14], %15 {strides = array<i32>} : memref<128x128xbf16, #tpu.memory_space<vmem>>, vector<128x128xbf16>,
    } else {
    }
    return
  }
  func.func @transform_0(%arg0: i32, %arg1: i32, %arg2: i32) -> (i32, i32) {
    %c0_i32 = arith.constant 0 : i32
    return %arg0, %arg2 : i32, i32
  }
  func.func @transform_1(%arg0: i32, %arg1: i32, %arg2: i32) -> (i32, i32) {
    %c0_i32 = arith.constant 0 : i32
    return %arg2, %arg1 : i32, i32
  }
  func.func @transform_2(%arg0: i32, %arg1: i32, %arg2: i32) -> (i32, i32) {
    %c0_i32 = arith.constant 0 : i32
    return %arg0, %arg1 : i32, i32
  }
}

</mosaic_0001>

<bundles_post_ra>
// kernel: tpu_custom_call.1
= control target key start
LH: loop header
LB: loop body
LE: loop exit
PB: predicated region body
PF: predicated region fallthrough
CT: control target
= control target key end

     0   :  { %vm129_vm0 = vcmask 392192   ;;  %s660_s0 = inlined_call_operand.vmem [shape: bf16[128,48], index: 0, kind: input, shape index: {}]   ;;  %s661_s1 = inlined_call_operand.vmem [shape: bf16[48,128], index: 1, kind: input, shape index: {}]   ;;  %s662_s2 = inlined_call_operand.hbm [shape: bf16[128,128], index: 2, kind: output, shape index: {}]  }
   0x1   :  { %v554_v0 = vld [vmem:[%s661_s1] sm:$0xff]   ;;  %v555_v1 = vld [vmem:[%s661_s1 + $0x8] sm:$0xff]   ;;  %v556_v2 = vld [vmem:[%s661_s1 + $0x10] sm:$0xff]  }
   0x2   :  { %523 = vmatprep.subr.bf16.mxu0 %v554_v0  ;;  %545 = vmatprep.subr.bf16.mxu1 %v554_v0  ;;  %v557_v3 = vld [vmem:[%s660_s0] sm:$0xff]   ;;  %v559_v5 = vld [vmem:[%s660_s0 + $0x8] sm:$0xff]   ;;  %v561_v7 = vld [vmem:[%s660_s0 + $0x10] sm:$0xff]  }
   0x3   :  { %524 = vmatpush3.bf16.msra.mxu0 %v554_v0  ;;  %548 = vmatpush3.bf16.msra.mxu1 %v554_v0  ;;  %v558_v4 = vld [vmem:[%s660_s0 + $0x20] sm:$0xff]   ;;  %v560_v6 = vld [vmem:[%s660_s0 + $0x28] sm:$0xff]   ;;  %v562_v8 = vld [vmem:[%s660_s0 + $0x30] sm:$0xff]  }
   0x4   :  { %525 = vmatprep.subr.bf16.mxu0 %v555_v1  ;;  %546 = vmatprep.subr.bf16.mxu1 %v555_v1 }
   0x5   :  { %529 = vmatprep.mubr.msk.bf16.mxu0 %vm129_vm0, %v557_v3  ;;  %537 = vmatprep.mubr.msk.bf16.mxu1 %vm129_vm0, %v558_v4 }
   0x7   :  { %526 = vmatpush3.bf16.msra.mxu0 %v555_v1  ;;  %549 = vmatpush3.bf16.msra.mxu1 %v555_v1 }
   0x8   :  { %527 = vmatprep.subr.bf16.mxu0 %v556_v2  ;;  %547 = vmatprep.subr.bf16.mxu1 %v556_v2 }
   0xb   :  { %528 = vmatpush3.bf16.msra.mxu0 %v556_v2  ;;  %550 = vmatpush3.bf16.msra.mxu1 %v556_v2 }
   0xc   :  { %7 = vsyncpa [#allocation4], 0  ;;  %v563_v9 = vld [vmem:[%s660_s0 + $0x18] sm:$0xff]  }
   0xd   :  { %v564_v10 = vld [vmem:[%s660_s0 + $0x38] sm:$0xff]   ;;  %s589_s0 = smov [#allocation3]  }
   0xe   :  { %530 = vmatmul.mubr.msk.bf16.vlgmr.msra.gmra.mrb[0].mxu0 %vm129_vm0, %v559_v5  ;;  %538 = vmatmul.mubr.msk.bf16.vlgmr.msra.gmra.mrb[0].mxu1 %vm129_vm0, %v560_v6  ;;  %s403_s30 = sshll.u32 %s589_s0, 4  ;;  %s404_s30 = int_to_ptr.vmem [resolvable:$true] %s403_s30 }
   0xf   :  { %533 = vmatprep.mubr.msk.bf16.mxu0 %vm129_vm0, %v561_v7  ;;  %541 = vmatprep.mubr.msk.bf16.mxu1 %vm129_vm0, %v562_v8  ;;  %s565_s3 = scalar_lea.vmem %s404_s30, 1024  ;;  %p570_p1 = scmp.lt.s32.totalorder %s404_s30, %s404_s30 }
  0x10   :  { %p566_p0 = scmp.ne.s32.totalorder %s404_s30, %s565_s3  ;;  %p571_p2 = scmp.lt.s32.totalorder %s565_s3, %s565_s3 }
  0x12   :  { %p572_p3 = por %p571_p2, %p570_p1 }
  0x14   :  { %p573_p4 = pnand %p572_p3, %p566_p0 }
  0x16   :  { %534 = vmatmul.mubr.msk.bf16.gmra.mrb[4].mxu0 %vm129_vm0, %v563_v9  ;;  %542 = vmatmul.mubr.msk.bf16.gmra.mrb[4].mxu1 %vm129_vm0, %v564_v10 }
  0xe1   :  { %v531_v11 = vpop.f32.mrb[0].mxu0  ;;  %v539_v12 = vpop.f32.mrb[0].mxu1 }
  0xe2   :  { %v188_v13 = vpop.f32.mrb[1].mxu0  ;;  %v220_v14 = vpop.f32.mrb[1].mxu1  ;;  %v304_v17 = vmax.f32 %v531_v11, 0.0  ;;  %v312_v18 = vmax.f32 %v539_v12, 0.0 }
  0xe3   :  { %v532_v15 = vpop.f32.mrb[2].mxu0  ;;  %v540_v16 = vpop.f32.mrb[2].mxu1  ;;  %v302_v23 = vmax.f32 %v188_v13, 0.0  ;;  %v310_v24 = vmax.f32 %v220_v14, 0.0 }
  0xe4   :  { %v305_v19 = vmax.f32 %v532_v15, 0.0  ;;  %v313_v20 = vmax.f32 %v540_v16, 0.0  ;;  %v191_v21 = vpop.f32.mrb[3].mxu0  ;;  %v223_v22 = vpop.f32.mrb[3].mxu1 }
  0xe5   :  { %v303_v25 = vmax.f32 %v191_v21, 0.0  ;;  %v311_v26 = vmax.f32 %v223_v22, 0.0 }
  0xe6   :  { %v473_v27 = vpack.c.bf16 %v305_v19, %v304_v17  ;;  %v493_v28 = vpack.c.bf16 %v313_v20, %v312_v18 }
  0xe7   :  { %v468_v29 = vpack.c.bf16 %v303_v25, %v302_v23  ;;  %v488_v30 = vpack.c.bf16 %v311_v26, %v310_v24 }
  0xe8   :  { %505 = vst [vmem:[#allocation3 + $0x8] sm:$0xff] %v473_v27   ;;  %509 = vst [vmem:[#allocation3 + $0x28] sm:$0xff] %v493_v28  }
  0xe9   :  { %469 = vst [vmem:[#allocation3] sm:$0xff] %v468_v29   ;;  %508 = vst [vmem:[#allocation3 + $0x20] sm:$0xff] %v488_v30   ;;  %v535_v31 = vpop.f32.mrb[4].mxu0  ;;  %v543_v32 = vpop.f32.mrb[4].mxu1 }
  0xea   :  { %v204_v33 = vpop.f32.mrb[5].mxu0  ;;  %v236_v34 = vpop.f32.mrb[5].mxu1  ;;  %v308_v37 = vmax.f32 %v535_v31, 0.0  ;;  %v316_v38 = vmax.f32 %v543_v32, 0.0 }
  0xeb   :  { %v536_v35 = vpop.f32.mrb[6].mxu0  ;;  %v544_v36 = vpop.f32.mrb[6].mxu1  ;;  %v306_v43 = vmax.f32 %v204_v33, 0.0  ;;  %v314_v44 = vmax.f32 %v236_v34, 0.0 }
  0xec   :  { %v309_v39 = vmax.f32 %v536_v35, 0.0  ;;  %v317_v40 = vmax.f32 %v544_v36, 0.0  ;;  %v207_v41 = vpop.f32.mrb[7].mxu0  ;;  %v239_v42 = vpop.f32.mrb[7].mxu1 }
  0xed   :  { %v307_v45 = vmax.f32 %v207_v41, 0.0  ;;  %v315_v46 = vmax.f32 %v239_v42, 0.0 }
  0xee   :  { %v483_v47 = vpack.c.bf16 %v309_v39, %v308_v37  ;;  %v503_v48 = vpack.c.bf16 %v317_v40, %v316_v38 }
  0xef   :  { %v478_v49 = vpack.c.bf16 %v307_v45, %v306_v43  ;;  %v498_v50 = vpack.c.bf16 %v315_v46, %v314_v44 }
  0xf0   :  { %507 = vst [vmem:[#allocation3 + $0x18] sm:$0xff] %v483_v47   ;;  %511 = vst [vmem:[#allocation3 + $0x38] sm:$0xff] %v503_v48  }
  0xf1   :  { %506 = vst [vmem:[#allocation3 + $0x10] sm:$0xff] %v478_v49   ;;  %510 = vst [vmem:[#allocation3 + $0x30] sm:$0xff] %v498_v50  }
  0xf2   :  { %576 = shalt.err (!%p573_p4)
}
  0xf3   :  { %s577_s6 = scalar_lea.hbm %s662_s2, 1024 }
  0xf4   :  { %p578_p5 = scmp.ne.s32.totalorder %s662_s2, %s577_s6  ;;  %p581_p6 = scmp.lt.u32.totalorder %s577_s6, %s662_s2 }
  0xf6   :  { %p583_p7 = pnand %p581_p6, %p578_p5 }
  0xf8   :  { %586 = shalt.err (!%p583_p7)
}
  0xf9   :  { %s590_s11 = smov 64   ;;  %s591_s12 = smov 4  }
  0xfa   :  { %409 = dma.vmem_to_hbm [thread:$0]  %s404_s30, 1024, %s662_s2, [#allocation4], %s590_s11, %s590_s11, %s591_s12  }
  0xfb   :  { %587 = dma.done.wait [#allocation4], 1024  }
  0xfc   :  { %588 = vsyncadd [#allocation4], 4294966272 }
  0xfd   :  { %413 = vsyncpa [#allocation4], 1 }

</bundles_post_ra>
